<compile_context>
chip_gen: v7x
topology: tpu7x:2x2x1
jax: 0.10.0
libtpu: 0.0.40
codegen_flags: <defaults>
</compile_context>

<pallas_src>
import jax
import jax.numpy as jnp
from jax.experimental import pallas as pl
from jax.experimental.pallas import tpu as pltpu


def _round_up(n, m):
    return ((n + m - 1) // m) * m


def mlp_kernel(x_ref, w1_ref, w2_ref, w3_ref, b_ref, o_ref):
    h1 = w1_ref.shape[1]      # 128
    h2p = w2_ref.shape[1]     # 64 padded to 128
    out_c = o_ref.shape[1]    # true output width (narrow store)

    # Cast x to bf16 in-kernel (rides spare VPU slots; avoids a wrapper pass).
    x = x_ref[...].astype(jnp.bfloat16)

    # layer 1: (TB, in_c)bf16 @ (in_c, 128)bf16 -> f32, bias + ReLU in f32
    h = jnp.dot(x, w1_ref[...], preferred_element_type=jnp.float32)
    h = jnp.maximum(h + b_ref[0:1, :h1], 0.0).astype(jnp.bfloat16)

    # layer 2: (TB, 128) @ (128, 128)  (hidden 64 zero-padded to 128)
    h = jnp.dot(h, w2_ref[...], preferred_element_type=jnp.float32)
    h = jnp.maximum(h + b_ref[1:2, :h2p], 0.0).astype(jnp.bfloat16)

    # layer 3: (TB, 128) @ (128, out_c) -- narrow output, final ReLU in f32
    h = jnp.dot(h, w3_ref[...], preferred_element_type=jnp.float32)
    h = jnp.maximum(h + b_ref[2:3, :out_c], 0.0)
    o_ref[...] = h.astype(o_ref.dtype)


def pack_params(params):
    """One-time weight prep: bf16 casts, 64->128 hidden padding, bias coalescing."""
    h1 = params["w1"].shape[1]                 # 128
    h2 = params["w2"].shape[1]                 # 64
    out_c = params["w3"].shape[1]
    h2p = _round_up(h2, 128)                   # 128

    w1 = params["w1"].astype(jnp.bfloat16)
    # pad hidden-64 columns of w2 and rows of w3 with zeros (mathematically inert:
    # padded activations are relu(0+0)=0 and multiply zero rows of w3).
    w2 = jnp.pad(params["w2"], ((0, 0), (0, h2p - h2))).astype(jnp.bfloat16)
    w3 = jnp.pad(params["w3"], ((0, h2p - h2), (0, 0))).astype(jnp.bfloat16)

    # Coalesce the three biases into a single (3, bw) f32 block (one DMA).
    bw = max(h1, h2p, out_c)
    b = jnp.zeros((3, bw), jnp.float32)
    b = b.at[0, :h1].set(params["b1"][0])
    b = b.at[1, :h2].set(params["b2"][0])
    b = b.at[2, :out_c].set(params["b3"][0])
    return {"w1": w1, "w2": w2, "w3": w3, "b": b}


def net_forward(x, packed, *, tb=4096):
    """Pallas implementation of Net.forward.

    x: (B, in_c) float32
    packed: output of pack_params()
    """
    B, in_c = x.shape
    w1, w2, w3, b = packed["w1"], packed["w2"], packed["w3"], packed["b"]
    h1 = w1.shape[1]
    h2p = w2.shape[1]
    out_c = w3.shape[1]
    bw = b.shape[1]

    # Balanced batch tiling: TB multiple of 8, padding bounded to <8 rows/tile.
    ntiles = pl.cdiv(B, tb)
    TB = _round_up(pl.cdiv(B, ntiles), 8)
    Bp = ntiles * TB
    x_p = x if Bp == B else jnp.pad(x, ((0, Bp - B), (0, 0)))

    out = pl.pallas_call(
        mlp_kernel,
        out_shape=jax.ShapeDtypeStruct((Bp, out_c), jnp.float32),
        grid=(ntiles,),
        in_specs=[
            pl.BlockSpec((TB, in_c), lambda i: (i, 0)),     # x: pipelined over batch
            pl.BlockSpec((in_c, h1), lambda i: (0, 0)),     # w1: VMEM-resident
            pl.BlockSpec((h1, h2p), lambda i: (0, 0)),      # w2: VMEM-resident
            pl.BlockSpec((h2p, out_c), lambda i: (0, 0)),   # w3: VMEM-resident
            pl.BlockSpec((3, bw), lambda i: (0, 0)),        # biases: VMEM-resident
        ],
        out_specs=pl.BlockSpec((TB, out_c), lambda i: (i, 0)),   # narrow f32 store
        compiler_params=pltpu.CompilerParams(
            dimension_semantics=("parallel",),
            vmem_limit_bytes=48 * 1024 * 1024,
        ),
    )(x_p, w1, w2, w3, b)

    return out if Bp == B else out[:B]


net_forward_jit = jax.jit(net_forward)


def init_params(key, in_c, out_c):
    """Deterministic init mirroring PyTorch Linear default (uniform +/- 1/sqrt(fan_in))."""
    dims = [in_c, 128, 64, out_c]
    params = {}
    for i in range(3):
        fan_in, fan_out = dims[i], dims[i + 1]
        key, kw, kb = jax.random.split(key, 3)
        bound = 1.0 / jnp.sqrt(fan_in)
        params[f"w{i+1}"] = jax.random.uniform(
            kw, (fan_in, fan_out), jnp.float32, minval=-bound, maxval=bound)
        params[f"b{i+1}"] = jax.random.uniform(
            kb, (1, fan_out), jnp.float32, minval=-bound, maxval=bound)
    return params


def reference_forward_bf16(x, params):
    """Pure-JAX reference mirroring the kernel's bf16-input / f32-accumulate math."""
    h = x.astype(jnp.bfloat16)
    for i in range(1, 4):
        w = params[f"w{i}"].astype(jnp.bfloat16)
        h = jnp.dot(h, w, preferred_element_type=jnp.float32) + params[f"b{i}"]
        h = jnp.maximum(h, 0.0)
        if i < 3:
            h = h.astype(jnp.bfloat16)
    return h


def reference_forward_f32(x, params):
    """Full-f32 reference matching PyTorch exactly (for a looser sanity check)."""
    h = x
    for i in range(1, 4):
        h = jnp.maximum(jnp.dot(h, params[f"w{i}"]) + params[f"b{i}"], 0.0)
    return h


if __name__ == "__main__":
    key = jax.random.PRNGKey(0)
    B, in_c, out_c = 8, 16, 8   # small shapes: state dim 16 -> 8 actions
    kx, kp = jax.random.split(key)
    x = jax.random.normal(kx, (B, in_c), jnp.float32)
    params = init_params(kp, in_c, out_c)
    packed = pack_params(params)   # one-time weight prep (hoisted out of forward)

    out = jax.block_until_ready(net_forward_jit(x, packed))
    assert out.shape == (B, out_c)
    # Tight check vs. a reference that mirrors the kernel's precision choice.
    assert jnp.allclose(out, reference_forward_bf16(x, params), atol=1e-3, rtol=1e-3)
    # Loose check vs. the exact f32 (PyTorch-equivalent) math.
    assert jnp.allclose(out, reference_forward_f32(x, params), atol=1e-1, rtol=1e-1)

    # Also exercise the batch-padding / balanced-tile path (B not a multiple of 8).
    B2 = 13
    x2 = jax.random.normal(jax.random.PRNGKey(1), (B2, in_c), jnp.float32)
    out2 = jax.block_until_ready(net_forward_jit(x2, packed))
    assert out2.shape == (B2, out_c)
    assert jnp.allclose(out2, reference_forward_bf16(x2, params), atol=1e-3, rtol=1e-3)

    print("KERNEL_OK")
</pallas_src>

<mosaic_0001>
module attributes {stable_mosaic.version = 11 : i64} {
  func.func @mlp_kernel(%arg0: i32, %arg1: memref<8x16xf32, #tpu.memory_space<vmem>>, %arg2: memref<16x128xbf16, #tpu.memory_space<vmem>>, %arg3: memref<128x128xbf16, #tpu.memory_space<vmem>>, %arg4: memref<128x8xbf16, #tpu.memory_space<vmem>>, %arg5: memref<3x128xf32, #tpu.memory_space<vmem>>, %arg6: memref<8x8xf32, #tpu.memory_space<vmem>>) attributes {dimension_semantics = [#tpu.dimension_semantics<parallel>], iteration_bounds = array<i64: 1>, scalar_prefetch = 0 : i64, scratch_operands = 0 : i64, tpu.core_type = #tpu.core_type<tc>, window_params = [{transform_indices = @transform_0, window_bounds = array<i64: 8, 16>}, {pipeline_mode = #tpu.pipeline_mode<synchronous>, transform_indices = @transform_1, window_bounds = array<i64: 16, 128>}, {pipeline_mode = #tpu.pipeline_mode<synchronous>, transform_indices = @transform_2, window_bounds = array<i64: 128, 128>}, {pipeline_mode = #tpu.pipeline_mode<synchronous>, transform_indices = @transform_3, window_bounds = array<i64: 128, 8>}, {pipeline_mode = #tpu.pipeline_mode<synchronous>, transform_indices = @transform_4, window_bounds = array<i64: 3, 128>}, {transform_indices = @transform_5, window_bounds = array<i64: 8, 8>}]} {
    %c0 = arith.constant 0 : index
    %c0_0 = arith.constant 0 : index
    %0 = vector.load %arg1[%c0, %c0_0] : memref<8x16xf32, #tpu.memory_space<vmem>>, vector<8x16xf32>
    %1 = arith.truncf %0 : vector<8x16xf32> to vector<8x16xbf16>
    %c0_1 = arith.constant 0 : index
    %c0_2 = arith.constant 0 : index
    %2 = vector.load %arg2[%c0_1, %c0_2] : memref<16x128xbf16, #tpu.memory_space<vmem>>, vector<16x128xbf16>
    %cst = arith.constant dense<0.000000e+00> : vector<8x128xf32>
    %3 = tpu.matmul %1, %2, %cst {dimension_numbers = #tpu.dot_dimension_numbers<[1], [0], [0], [1], [0, 0, 1, 1], [], []>} : vector<8x16xbf16>, vector<16x128xbf16>, vector<8x128xf32> -> vector<8x128xf32>
    %c0_3 = arith.constant 0 : index
    %c0_4 = arith.constant 0 : index
    %4 = vector.load %arg5[%c0_3, %c0_4] : memref<3x128xf32, #tpu.memory_space<vmem>>, vector<1x128xf32>
    %5 = vector.broadcast %4 : vector<1x128xf32> to vector<8x128xf32>
    %6 = arith.addf %3, %5 : vector<8x128xf32>
    %cst_5 = arith.constant 0.000000e+00 : f32
    %7 = vector.broadcast %cst_5 : f32 to vector<8x128xf32>
    %8 = arith.maximumf %6, %7 : vector<8x128xf32>
    %9 = arith.truncf %8 : vector<8x128xf32> to vector<8x128xbf16>
    %c0_6 = arith.constant 0 : index
    %c0_7 = arith.constant 0 : index
    %10 = vector.load %arg3[%c0_6, %c0_7] : memref<128x128xbf16, #tpu.memory_space<vmem>>, vector<128x128xbf16>
    %cst_8 = arith.constant dense<0.000000e+00> : vector<8x128xf32>
    %11 = tpu.matmul %9, %10, %cst_8 {dimension_numbers = #tpu.dot_dimension_numbers<[1], [0], [0], [1], [0, 0, 1, 1], [], []>} : vector<8x128xbf16>, vector<128x128xbf16>, vector<8x128xf32> -> vector<8x128xf32>
    %c1 = arith.constant 1 : index
    %c0_9 = arith.constant 0 : index
    %12 = vector.load %arg5[%c1, %c0_9] : memref<3x128xf32, #tpu.memory_space<vmem>>, vector<1x128xf32>
    %13 = vector.broadcast %12 : vector<1x128xf32> to vector<8x128xf32>
    %14 = arith.addf %11, %13 : vector<8x128xf32>
    %cst_10 = arith.constant 0.000000e+00 : f32
    %15 = vector.broadcast %cst_10 : f32 to vector<8x128xf32>
    %16 = arith.maximumf %14, %15 : vector<8x128xf32>
    %17 = arith.truncf %16 : vector<8x128xf32> to vector<8x128xbf16>
    %c0_11 = arith.constant 0 : index
    %c0_12 = arith.constant 0 : index
    %18 = vector.load %arg4[%c0_11, %c0_12] : memref<128x8xbf16, #tpu.memory_space<vmem>>, vector<128x8xbf16>
    %cst_13 = arith.constant dense<0.000000e+00> : vector<8x8xf32>
    %19 = tpu.matmul %17, %18, %cst_13 {dimension_numbers = #tpu.dot_dimension_numbers<[1], [0], [0], [1], [0, 0, 1, 1], [], []>} : vector<8x128xbf16>, vector<128x8xbf16>, vector<8x8xf32> -> vector<8x8xf32>
    %c2 = arith.constant 2 : index
    %c0_14 = arith.constant 0 : index
    %20 = vector.load %arg5[%c2, %c0_14] : memref<3x128xf32, #tpu.memory_space<vmem>>, vector<1x8xf32>
    %21 = vector.broadcast %20 : vector<1x8xf32> to vector<8x8xf32>
    %22 = arith.addf %19, %21 : vector<8x8xf32>
    %cst_15 = arith.constant 0.000000e+00 : f32
    %23 = vector.broadcast %cst_15 : f32 to vector<8x8xf32>
    %24 = arith.maximumf %22, %23 : vector<8x8xf32>
    %c0_16 = arith.constant 0 : index
    %c0_17 = arith.constant 0 : index
    %25 = vector.load %arg6[%c0_16, %c0_17] : memref<8x8xf32, #tpu.memory_space<vmem>>, vector<8x8xf32>
    tpu.vector_store %arg6[%c0_16, %c0_17], %24 {strides = array<i32>} : memref<8x8xf32, #tpu.memory_space<vmem>>, vector<8x8xf32>,
    return
  }
  func.func @transform_0(%arg0: i32) -> (i32, i32) {
    %c0_i32 = arith.constant 0 : i32
    %c0_i32_0 = arith.constant 0 : i32
    return %arg0, %c0_i32 : i32, i32
  }
  func.func @transform_1(%arg0: i32) -> (i32, i32) {
    %c0_i32 = arith.constant 0 : i32
    %c0_i32_0 = arith.constant 0 : i32
    %c0_i32_1 = arith.constant 0 : i32
    return %c0_i32, %c0_i32_0 : i32, i32
  }
  func.func @transform_2(%arg0: i32) -> (i32, i32) {
    %c0_i32 = arith.constant 0 : i32
    %c0_i32_0 = arith.constant 0 : i32
    %c0_i32_1 = arith.constant 0 : i32
    return %c0_i32, %c0_i32_0 : i32, i32
  }
  func.func @transform_3(%arg0: i32) -> (i32, i32) {
    %c0_i32 = arith.constant 0 : i32
    %c0_i32_0 = arith.constant 0 : i32
    %c0_i32_1 = arith.constant 0 : i32
    return %c0_i32, %c0_i32_0 : i32, i32
  }
  func.func @transform_4(%arg0: i32) -> (i32, i32) {
    %c0_i32 = arith.constant 0 : i32
    %c0_i32_0 = arith.constant 0 : i32
    %c0_i32_1 = arith.constant 0 : i32
    return %c0_i32, %c0_i32_0 : i32, i32
  }
  func.func @transform_5(%arg0: i32) -> (i32, i32) {
    %c0_i32 = arith.constant 0 : i32
    %c0_i32_0 = arith.constant 0 : i32
    return %arg0, %c0_i32 : i32, i32
  }
}

</mosaic_0001>

<bundles_post_ra>
// kernel: net_forward.1
= control target key start
LH: loop header
LB: loop body
LE: loop exit
PB: predicated region body
PF: predicated region fallthrough
CT: control target
= control target key end

     0   :  { %10 = vsyncpa [#allocation3], 0  ;;  %s633_s0 = inlined_call_operand.vmem [shape: f32[8,16], index: 0, kind: input, shape index: {}]   ;;  %s634_s1 = inlined_call_operand.hbm [shape: bf16[16,128], index: 1, kind: input, shape index: {}]   ;;  %s635_s2 = inlined_call_operand.vmem [shape: bf16[128,128], index: 2, kind: input, shape index: {}]   ;;  %s636_s3 = inlined_call_operand.vmem [shape: bf16[128,8], index: 3, kind: input, shape index: {}]   ;;  %s637_s4 = inlined_call_operand.vmem [shape: f32[3,128], index: 4, kind: input, shape index: {}]   ;;  %s638_s5 = inlined_call_operand.hbm [shape: f32[8,8], index: 5, kind: output, shape index: {}]  }
   0x1   :  { %11 = vsyncpa [#allocation4], 0  ;;  %s493_s18 = smov [#allocation2]   ;;  %s445_s22 = scalar_lea.hbm %s634_s1, 128 }
   0x2   :  { %s19_s19 = sshll.u32 %s493_s18, 4  ;;  %p446_p0 = scmp.ne.s32.totalorder %s634_s1, %s445_s22  ;;  %s20_s19 = int_to_ptr.vmem [resolvable:$true] %s19_s19 }
   0x3   :  { %p449_p1 = scmp.lt.u32.totalorder %s445_s22, %s634_s1 }
   0x5   :  { %p451_p2 = pnand %p449_p1, %p446_p0 }
   0x7   :  { %454 = shalt.err (!%p451_p2)
}
   0x8   :  { %s455_s27 = scalar_lea.vmem %s20_s19, 128  ;;  %p460_p4 = scmp.lt.s32.totalorder %s20_s19, %s20_s19 }
   0x9   :  { %p456_p3 = scmp.ne.s32.totalorder %s20_s19, %s455_s27  ;;  %p461_p5 = scmp.lt.s32.totalorder %s455_s27, %s455_s27 }
   0xb   :  { %p462_p6 = por %p461_p5, %p460_p4 }
   0xd   :  { %p463_p7 = pnand %p462_p6, %p456_p3 }
   0xf   :  { %466 = shalt.err (!%p463_p7)
}
  0x10   :  { %s494_s28 = smov 64   ;;  %s495_s29 = smov 4  }
  0x11   :  { %25 = dma.hbm_to_vmem [thread:$0]  %s634_s1, 128, %s20_s19, [#allocation3], %s494_s28, %s494_s28, %s495_s29  }
  0x12   :  { %489 = dma.done.wait [#allocation3], 128  }
  0x13   :  { %490 = vsyncadd [#allocation3], 4294967168  ;;  %v496_v0 = vmov 0.0   ;;  %vm497_vm0 = vmmov 0   ;;  %v428_v1 = vld [vmem:[#allocation2] sm:$0xff]   ;;  %vm51_vm1 = vcmask 130048  }
  0x14   :  { %376 = vmatprep.subr.bf16.mxu0 %v496_v0  ;;  %378 = vmatprep.mubr.msk.bf16.mxu0 %vm497_vm0, %v496_v0  ;;  %v36_v2 = vld [vmem:[%s633_s0] sm:$0xff]  ;;  %v430_v5 = vld [vmem:[%s635_s2 + $0x8] sm:$0xff]   ;;  %v431_v6 = vld [vmem:[%s635_s2 + $0x10] sm:$0xff]   ;;  %s498_s17 = smov [#allocation5]   ;;  %vm318_vm2 = vcmask 64512  }
  0x15   :  { %382 = vmatprep.subr.bf16.mxu1 %v496_v0  ;;  %398 = vmatprep.mubr.msk.bf16.mxu1 %vm497_vm0, %v496_v0  ;;  %v37_v3 = vpack.c.bf16 %v36_v2, %v36_v2  ;;  %v429_v4 = vld [vmem:[%s635_s2] sm:$0xff]   ;;  %v432_v7 = vld [vmem:[%s635_s2 + $0x18] sm:$0xff]   ;;  %v434_v9 = vld [vmem:[%s635_s2 + $0x28] sm:$0xff]  }
  0x16   :  { %377 = vmatpush3.bf16.msra.mxu0 %v428_v1  ;;  %383 = vmatpush3.bf16.msra.mxu1 %v429_v4  ;;  %v433_v8 = vld [vmem:[%s635_s2 + $0x20] sm:$0xff]   ;;  %v435_v10 = vld [vmem:[%s635_s2 + $0x30] sm:$0xff]   ;;  %v436_v11 = vld [vmem:[%s635_s2 + $0x38] sm:$0xff]  }
  0x17   :  { %402 = vmatprep.subr.bf16.mxu0 %v496_v0  ;;  %384 = vmatprep.subr.bf16.mxu1 %v496_v0  ;;  %v437_v12 = vld [vmem:[%s636_s3] sm:$0xff]   ;;  %v438_v13 = vld [vmem:[%s636_s3 + $0x8] sm:$0xff]   ;;  %v439_v14 = vld [vmem:[%s636_s3 + $0x10] sm:$0xff]  }
  0x18   :  { %v440_v15 = vld [vmem:[%s636_s3 + $0x18] sm:$0xff]   ;;  %v441_v16 = vld [vmem:[%s636_s3 + $0x20] sm:$0xff]   ;;  %v442_v17 = vld [vmem:[%s636_s3 + $0x28] sm:$0xff]  }
  0x19   :  { %379 = vmatmul.mubr.msk.bf16.vlgmr.msra.gmra.mrb[0].mxu0 %vm51_vm1, %v37_v3  ;;  %v335_v18 = vld [vmem:[%s637_s4] ss:$0 sm:$0xff]  ;;  %v443_v26 = vld [vmem:[%s636_s3 + $0x30] sm:$0xff]   ;;  %v444_v27 = vld [vmem:[%s636_s3 + $0x38] sm:$0xff]   ;;  %s326_s3 = sshll.u32 %s498_s17, 4  ;;  %s327_s3 = int_to_ptr.vmem [resolvable:$true] %s326_s3 }
  0x1a   :  { %418 = vmatprep.mubr.msk.bf16.mxu0 %vm497_vm0, %v496_v0  ;;  %385 = vmatpush3.bf16.msra.mxu1 %v430_v5  ;;  %v338_v28 = vld [vmem:[%s637_s4 + $0x1] ss:$0 sm:$0xff]  ;;  %v347_v36 = vld [vmem:[%s637_s4 + $0x2] ss:$0 sm:$0xff]  ;;  %s467_s18 = scalar_lea.vmem %s327_s3, 128  ;;  %p472_p9 = scmp.lt.s32.totalorder %s327_s3, %s327_s3 }
  0x1b   :  { %386 = vmatprep.subr.bf16.mxu1 %v496_v0  ;;  %403 = vmatpush3.bf16.msra.mxu0 %v437_v12  ;;  %p468_p8 = scmp.ne.s32.totalorder %s327_s3, %s467_s18  ;;  %p473_p10 = scmp.lt.s32.totalorder %s467_s18, %s467_s18 }
  0x1c   :  { %404 = vmatprep.subr.bf16.mxu0 %v496_v0 }
  0x1d   :  { %p474_p11 = por %p473_p10, %p472_p9 }
  0x1e   :  { %387 = vmatpush3.bf16.msra.mxu1 %v431_v6 }
  0x1f   :  { %388 = vmatprep.subr.bf16.mxu1 %v496_v0  ;;  %405 = vmatpush3.bf16.msra.mxu0 %v438_v13  ;;  %p475_p12 = pnand %p474_p11, %p468_p8 }
  0x20   :  { %406 = vmatprep.subr.bf16.mxu0 %v496_v0 }
  0x22   :  { %389 = vmatpush3.bf16.msra.mxu1 %v432_v7 }
  0x23   :  { %390 = vmatprep.subr.bf16.mxu1 %v496_v0  ;;  %407 = vmatpush3.bf16.msra.mxu0 %v439_v14 }
  0x24   :  { %408 = vmatprep.subr.bf16.mxu0 %v496_v0 }
  0x26   :  { %391 = vmatpush3.bf16.msra.mxu1 %v433_v8 }
  0x27   :  { %392 = vmatprep.subr.bf16.mxu1 %v496_v0  ;;  %409 = vmatpush3.bf16.msra.mxu0 %v440_v15 }
  0x28   :  { %410 = vmatprep.subr.bf16.mxu0 %v496_v0 }
  0x2a   :  { %393 = vmatpush3.bf16.msra.mxu1 %v434_v9 }
  0x2b   :  { %394 = vmatprep.subr.bf16.mxu1 %v496_v0  ;;  %411 = vmatpush3.bf16.msra.mxu0 %v441_v16 }
  0x2c   :  { %412 = vmatprep.subr.bf16.mxu0 %v496_v0 }
  0x2e   :  { %395 = vmatpush3.bf16.msra.mxu1 %v435_v10 }
  0x2f   :  { %396 = vmatprep.subr.bf16.mxu1 %v496_v0  ;;  %413 = vmatpush3.bf16.msra.mxu0 %v442_v17 }
  0x30   :  { %414 = vmatprep.subr.bf16.mxu0 %v496_v0 }
  0x32   :  { %397 = vmatpush3.bf16.msra.mxu1 %v436_v11 }
  0x33   :  { %415 = vmatpush3.bf16.msra.mxu0 %v443_v26 }
  0x34   :  { %416 = vmatprep.subr.bf16.mxu0 %v496_v0 }
  0x37   :  { %417 = vmatpush3.bf16.msra.mxu0 %v444_v27 }
  0xec   :  { %v89_v19 = vpop.f32.mrb[0].mxu0 }
  0xed   :  { %v90_v20 = vadd.f32 %v335_v18, %v89_v19  ;;  %v380_v21 = vpop.f32.mrb[1].mxu0 }
  0xee   :  { %v92_v22 = vpop.f32.mrb[2].mxu0 }
  0xef   :  { %v95_v23 = vmax.f32 %v90_v20, 0.0  ;;  %v381_v24 = vpop.f32.mrb[3].mxu0 }
  0xf1   :  { %v96_v25 = vpack.c.bf16 %v95_v23, %v95_v23 }
  0xf3   :  { %399 = vmatmul.mubr.bf16.vlgmr.msra.gmra.mrb[0].mxu1 %v96_v25 }
 0x1c6   :  { %v200_v29 = vpop.f32.mrb[0].mxu1 }
 0x1c7   :  { %v201_v30 = vadd.f32 %v338_v28, %v200_v29  ;;  %v400_v31 = vpop.f32.mrb[1].mxu1 }
 0x1c8   :  { %v203_v32 = vpop.f32.mrb[2].mxu1 }
 0x1c9   :  { %v206_v33 = vmax.f32 %v201_v30, 0.0  ;;  %v401_v34 = vpop.f32.mrb[3].mxu1 }
 0x1cb   :  { %v207_v35 = vpack.c.bf16 %v206_v33, %v206_v33 }
 0x1cd   :  { %419 = vmatmul.mubr.bf16.vlgmr.msra.gmra.mrb[4].mxu0 %v207_v35 }
 0x2a0   :  { %v311_v37 = vpop.f32.mrb[4].mxu0 }
 0x2a1   :  { %v312_v38 = vadd.f32 %v347_v36, %v311_v37  ;;  %v420_v39 = vpop.f32.mrb[5].mxu0 }
 0x2a2   :  { %v314_v40 = vpop.f32.mrb[6].mxu0 }
 0x2a3   :  { %v317_v41 = vmax.f32 %v312_v38, 0.0  ;;  %v421_v42 = vpop.f32.mrb[7].mxu0 }
 0x2a5   :  { %319 = vst.msk [vmem:[#allocation5] sm:$0xff] %vm318_vm2, %v317_v41 }
 0x2a6   :  { %478 = shalt.err (!%p475_p12)
}
 0x2a7   :  { %s479_s20 = scalar_lea.hbm %s638_s5, 128 }
 0x2a8   :  { %p480_p13 = scmp.ne.s32.totalorder %s638_s5, %s479_s20  ;;  %p483_p0 = scmp.lt.u32.totalorder %s479_s20, %s638_s5 }
 0x2aa   :  { %p485_p1 = pnand %p483_p0, %p480_p13 }
 0x2ac   :  { %488 = shalt.err (!%p485_p1)
}
 0x2ad   :  { %329 = dma.vmem_to_hbm [thread:$0]  %s327_s3, 128, %s638_s5, [#allocation4]  }
 0x2ae   :  { %491 = dma.done.wait [#allocation4], 128  }
 0x2af   :  { %492 = vsyncadd [#allocation4], 4294967168 }
 0x2b0   :  { %333 = vsyncpa [#allocation3], 1 }
 0x2b1   :  { %334 = vsyncpa [#allocation4], 1 }

</bundles_post_ra>
